<compile_context>
chip_gen: v5e
topology: v5e:2x2
jax: 0.10.0
libtpu: 0.0.40
codegen_flags: <defaults>
</compile_context>

<pallas_src>
import jax
import jax.numpy as jnp
from jax.experimental import pallas as pl
from jax.experimental.pallas import tpu as pltpu

_LANE = 128
_VMEM_LIMIT = 48 * 1024 * 1024
_X_BLOCK_BYTES_CAP = 2 * 1024 * 1024   # cap on one (TB, C, TH) f32 input block


def _pick_tiles(B, C, HW, *, tb_max=8):
    """Choose a batch tile (divisor of B) and spatial tile (128-multiple divisor of HW)."""
    tb = 1
    for cand in range(min(B, tb_max), 0, -1):
        if B % cand == 0:
            tb = cand
            break
    max_th = max(_LANE, _X_BLOCK_BYTES_CAP // (4 * C * tb))
    if HW <= max_th or HW % _LANE != 0:
        th = HW                              # full-extent block (always legal)
    else:
        th = HW                              # fallback
        cand = (max_th // _LANE) * _LANE
        while cand >= _LANE:
            if HW % cand == 0:
                th = cand
                break
            cand -= _LANE
    return tb, th


# ---------------------------------------------------------------------------
# Pass A: pooled = mean(|x|, spatial); wt = sigmoid(pooled @ fc1_w.T + fc1_b)
# ---------------------------------------------------------------------------
def _make_pool_fc_kernel(inv_hw):
    def kernel(x_ref, w_ref, b_ref, wt_ref, acc_ref):
        # x_ref:  (TB, C, TH)  spatial tile of |inputs| source
        # w_ref:  (C, C)       fc1 weight, already transposed (y = pooled @ w)
        # b_ref:  (1, C)       fc1 bias
        # wt_ref: (TB, 1, C)   channel attention weight (lane-dense output)
        # acc_ref:(TB, C)      f32 running sum of |x| over spatial tiles
        k = pl.program_id(1)

        @pl.when(k == 0)
        def _():
            acc_ref[...] = jnp.zeros_like(acc_ref)

        acc_ref[...] += jnp.sum(jnp.abs(x_ref[...].astype(jnp.float32)), axis=-1)

        @pl.when(k == pl.num_programs(1) - 1)
        def _():
            pooled = acc_ref[...] * inv_hw                               # (TB, C)
            y = jnp.dot(pooled, w_ref[...],
                        preferred_element_type=jnp.float32)              # (TB, C)
            y = y + b_ref[...]                                           # (1, C) broadcast
            wt_ref[...] = jax.nn.sigmoid(y)[:, None, :].astype(wt_ref.dtype)

    return kernel


# ---------------------------------------------------------------------------
# Pass B: elementwise apply (spatial attention + channel attention + max)
# ---------------------------------------------------------------------------
def _apply_kernel(x_ref, csw_ref, wt_ref, out_ref, csx_ref):
    # x_ref:   (TB, C, TH)
    # csw_ref: (1, C, 1)    1x1 conv weight, broadcast over batch & lanes
    # wt_ref:  (TB, C, 1)   channel attention weight
    # out_ref: (TB, C, TH)
    # csx_ref: (TB, 1, TH)
    x = x_ref[...]
    # 1x1 conv over channels on the VPU/XLU (multiply + sublane-axis reduction),
    # avoiding an M=1 MXU matmul.
    cs = jnp.sum(x * csw_ref[...], axis=1, keepdims=True)                # (TB, 1, TH)
    cs = jax.nn.sigmoid(cs)
    inputs_c = cs * x                                                    # (TB, C, TH)
    inputs_s = wt_ref[...] * x                                           # (TB, C, TH)
    out_ref[...] = jnp.maximum(inputs_c, inputs_s).astype(out_ref.dtype)
    csx_ref[...] = cs.astype(csx_ref.dtype)


def attention_weight_channel(x, cs_w, fc1_w, fc1_b):
    """x: (B, C, H, W) float32. cs_w: (1, C). fc1_w: (C, C). fc1_b: (1, C)."""
    B, C, H, W = x.shape
    HW = H * W
    xr = x.reshape(B, C, HW)

    tb, th = _pick_tiles(B, C, HW)
    nb = B // tb
    nk = pl.cdiv(HW, th)

    fc1_wt = jnp.asarray(fc1_w).T                 # (C, C): y = pooled @ fc1_w.T
    fc1_b2 = jnp.asarray(fc1_b).reshape(1, C)
    csw3 = jnp.asarray(cs_w).reshape(1, C, 1)     # C on sublanes, broadcast over lanes

    # ---- Pass A: channel attention weight (B, 1, C), lane-dense ----
    wt = pl.pallas_call(
        _make_pool_fc_kernel(1.0 / HW),
        out_shape=jax.ShapeDtypeStruct((B, 1, C), jnp.float32),
        grid=(nb, nk),
        in_specs=[
            pl.BlockSpec((tb, C, th), lambda b, k: (b, 0, k)),
            pl.BlockSpec((C, C), lambda b, k: (0, 0)),
            pl.BlockSpec((1, C), lambda b, k: (0, 0)),
        ],
        out_specs=pl.BlockSpec((tb, 1, C), lambda b, k: (b, 0, 0)),
        scratch_shapes=[pltpu.VMEM((tb, C), jnp.float32)],
        compiler_params=pltpu.CompilerParams(
            dimension_semantics=("parallel", "arbitrary"),
            vmem_limit_bytes=_VMEM_LIMIT),
        cost_estimate=pl.CostEstimate(
            flops=int(2 * B * C * C + 2 * B * C * HW),
            transcendentals=int(B * C),
            bytes_accessed=int(4 * (B * C * HW + B * C + 2 * C * C))),
    )(xr, fc1_wt, fc1_b2)

    wt_bc1 = jnp.swapaxes(wt, 1, 2)               # (B, C, 1) for per-channel broadcast

    # ---- Pass B: elementwise apply, tiled over (batch, spatial) ----
    out, csx = pl.pallas_call(
        _apply_kernel,
        out_shape=(
            jax.ShapeDtypeStruct((B, C, HW), x.dtype),   # output
            jax.ShapeDtypeStruct((B, 1, HW), x.dtype),   # cs_x
        ),
        grid=(nb, nk),
        in_specs=[
            pl.BlockSpec((tb, C, th), lambda b, k: (b, 0, k)),
            pl.BlockSpec((1, C, 1), lambda b, k: (0, 0, 0)),
            pl.BlockSpec((tb, C, 1), lambda b, k: (b, 0, 0)),
        ],
        out_specs=(
            pl.BlockSpec((tb, C, th), lambda b, k: (b, 0, k)),
            pl.BlockSpec((tb, 1, th), lambda b, k: (b, 0, k)),
        ),
        compiler_params=pltpu.CompilerParams(
            dimension_semantics=("parallel", "parallel"),
            vmem_limit_bytes=_VMEM_LIMIT),
        cost_estimate=pl.CostEstimate(
            flops=int(2 * B * C * HW + 5 * B * C * HW),
            transcendentals=int(B * HW),
            bytes_accessed=int(4 * (2 * B * C * HW + B * HW + B * C + C))),
    )(xr, csw3, wt_bc1)

    return (out.reshape(B, C, H, W),
            csx.reshape(B, 1, H, W),
            wt.reshape(B, C, 1, 1))


def _reference(x, cs_w, fc1_w, fc1_b):
    # Pure-JAX reference mirroring the PyTorch forward.
    cs = jax.nn.sigmoid(jnp.einsum('c,bchw->bhw', cs_w[0], x))[:, None]      # (B,1,H,W)
    inputs_c = cs * x
    pooled = jnp.mean(jnp.abs(x), axis=(2, 3))                                # (B,C)
    wt = jax.nn.sigmoid(pooled @ fc1_w.T + fc1_b[0])                          # (B,C)
    inputs_s = wt[:, :, None, None] * x
    return jnp.maximum(inputs_c, inputs_s), cs, wt[:, :, None, None]


if __name__ == "__main__":
    # Small shapes consistent with the module: AvgPool2d((w,h)) fully reduces
    # the spatial map, so spatial size == (w, h).
    B, C, H, W = 2, 4, 16, 16

    key = jax.random.PRNGKey(0)
    k_x, k_cs, k_w1, k_b1 = jax.random.split(key, 4)

    x = jax.random.normal(k_x, (B, C, H, W), dtype=jnp.float32)
    cs_w = jax.random.normal(k_cs, (1, C), dtype=jnp.float32) * 0.1   # Conv2d(C,1,1,bias=False) weight
    fc1_w = jax.random.normal(k_w1, (C, C), dtype=jnp.float32) * 0.1  # Linear(C,C) weight
    fc1_b = jax.random.normal(k_b1, (1, C), dtype=jnp.float32) * 0.1  # Linear(C,C) bias

    out, cs_x, weight = attention_weight_channel(x, cs_w, fc1_w, fc1_b)
    jax.block_until_ready((out, cs_x, weight))

    ref_out, ref_cs, ref_wt = _reference(x, cs_w, fc1_w, fc1_b)
    assert out.shape == (B, C, H, W)
    assert cs_x.shape == (B, 1, H, W)
    assert weight.shape == (B, C, 1, 1)
    assert jnp.allclose(out, ref_out, rtol=1e-5, atol=1e-5)
    assert jnp.allclose(cs_x, ref_cs, rtol=1e-5, atol=1e-5)
    assert jnp.allclose(weight, ref_wt, rtol=1e-5, atol=1e-5)

    print("KERNEL_OK")
</pallas_src>

<mosaic_0001>
module attributes {stable_mosaic.version = 11 : i64} {
  func.func @kernel(%arg0: i32, %arg1: i32, %arg2: memref<2x4x256xf32, #tpu.memory_space<vmem>>, %arg3: memref<4x4xf32, #tpu.memory_space<vmem>>, %arg4: memref<1x4xf32, #tpu.memory_space<vmem>>, %arg5: memref<2x1x4xf32, #tpu.memory_space<vmem>>, %arg6: memref<2x4xf32, #tpu.memory_space<vmem>>) attributes {dimension_semantics = [#tpu.dimension_semantics<parallel>, #tpu.dimension_semantics<arbitrary>], iteration_bounds = array<i64: 1, 1>, scalar_prefetch = 0 : i64, scratch_operands = 1 : i64, tpu.core_type = #tpu.core_type<tc>, window_params = [{transform_indices = @transform_0, window_bounds = array<i64: 2, 4, 256>}, {pipeline_mode = #tpu.pipeline_mode<synchronous>, transform_indices = @transform_1, window_bounds = array<i64: 4, 4>}, {pipeline_mode = #tpu.pipeline_mode<synchronous>, transform_indices = @transform_2, window_bounds = array<i64: 1, 4>}, {transform_indices = @transform_3, window_bounds = array<i64: 2, 1, 4>}]} {
    %c0_i32 = arith.constant 0 : i32
    %0 = arith.cmpi eq, %arg1, %c0_i32 : i32
    %1 = arith.extui %0 : i1 to i32
    %c0_i32_0 = arith.constant 0 : i32
    %2 = arith.cmpi ne, %1, %c0_i32_0 : i32
    scf.if %2 {
      %cst_9 = arith.constant 0.000000e+00 : f32
      %12 = vector.broadcast %cst_9 : f32 to vector<2x4xf32>
      %c0_10 = arith.constant 0 : index
      %c0_11 = arith.constant 0 : index
      %13 = vector.load %arg6[%c0_10, %c0_11] : memref<2x4xf32, #tpu.memory_space<vmem>>, vector<2x4xf32>
      tpu.vector_store %arg6[%c0_10, %c0_11], %12 {strides = array<i32>} : memref<2x4xf32, #tpu.memory_space<vmem>>, vector<2x4xf32>,
    } else {
    }
    %c0 = arith.constant 0 : index
    %c0_1 = arith.constant 0 : index
    %3 = vector.load %arg6[%c0, %c0_1] : memref<2x4xf32, #tpu.memory_space<vmem>>, vector<2x4xf32>
    %c0_2 = arith.constant 0 : index
    %c0_3 = arith.constant 0 : index
    %c0_4 = arith.constant 0 : index
    %4 = vector.load %arg2[%c0_2, %c0_3, %c0_4] : memref<2x4x256xf32, #tpu.memory_space<vmem>>, vector<2x4x256xf32>
    %5 = math.absf %4 : vector<2x4x256xf32>
    %cst = arith.constant dense<0.000000e+00> : vector<2x4xf32>
    %6 = vector.multi_reduction <add>, %5, %cst [2] : vector<2x4x256xf32> to vector<2x4xf32>
    %7 = arith.addf %3, %6 : vector<2x4xf32>
    %c0_5 = arith.constant 0 : index
    %c0_6 = arith.constant 0 : index
    %8 = vector.load %arg6[%c0_5, %c0_6] : memref<2x4xf32, #tpu.memory_space<vmem>>, vector<2x4xf32>
    tpu.vector_store %arg6[%c0_5, %c0_6], %7 {strides = array<i32>} : memref<2x4xf32, #tpu.memory_space<vmem>>, vector<2x4xf32>,
    %c0_i32_7 = arith.constant 0 : i32
    %9 = arith.cmpi eq, %arg1, %c0_i32_7 : i32
    %10 = arith.extui %9 : i1 to i32
    %c0_i32_8 = arith.constant 0 : i32
    %11 = arith.cmpi ne, %10, %c0_i32_8 : i32
    scf.if %11 {
      %c0_9 = arith.constant 0 : index
      %c0_10 = arith.constant 0 : index
      %12 = vector.load %arg6[%c0_9, %c0_10] : memref<2x4xf32, #tpu.memory_space<vmem>>, vector<2x4xf32>
      %cst_11 = arith.constant 3.906250e-03 : f32
      %13 = vector.broadcast %cst_11 : f32 to vector<2x4xf32>
      %14 = arith.mulf %12, %13 : vector<2x4xf32>
      %c0_12 = arith.constant 0 : index
      %c0_13 = arith.constant 0 : index
      %15 = vector.load %arg3[%c0_12, %c0_13] : memref<4x4xf32, #tpu.memory_space<vmem>>, vector<4x4xf32>
      %cst_14 = arith.constant dense<0.000000e+00> : vector<2x4xf32>
      %16 = tpu.matmul %14, %15, %cst_14 {dimension_numbers = #tpu.dot_dimension_numbers<[1], [0], [0], [1], [0, 0, 1, 1], [], []>} : vector<2x4xf32>, vector<4x4xf32>, vector<2x4xf32> -> vector<2x4xf32>
      %c0_15 = arith.constant 0 : index
      %c0_16 = arith.constant 0 : index
      %17 = vector.load %arg4[%c0_15, %c0_16] : memref<1x4xf32, #tpu.memory_space<vmem>>, vector<1x4xf32>
      %18 = vector.broadcast %17 : vector<1x4xf32> to vector<2x4xf32>
      %19 = arith.addf %16, %18 : vector<2x4xf32>
      %20 = arith.negf %19 : vector<2x4xf32>
      %21 = math.exp %20 : vector<2x4xf32>
      %cst_17 = arith.constant 1.000000e+00 : f32
      %22 = vector.broadcast %cst_17 : f32 to vector<2x4xf32>
      %23 = arith.addf %22, %21 : vector<2x4xf32>
      %24 = arith.divf %22, %23 : vector<2x4xf32>
      %25 = vector.shape_cast %24 : vector<2x4xf32> to vector<2x1x4xf32>
      %c0_18 = arith.constant 0 : index
      %c0_19 = arith.constant 0 : index
      %c0_20 = arith.constant 0 : index
      %26 = vector.load %arg5[%c0_18, %c0_19, %c0_20] : memref<2x1x4xf32, #tpu.memory_space<vmem>>, vector<2x1x4xf32>
      tpu.vector_store %arg5[%c0_18, %c0_19, %c0_20], %25 {strides = array<i32>} : memref<2x1x4xf32, #tpu.memory_space<vmem>>, vector<2x1x4xf32>,
    } else {
    }
    return
  }
  func.func @transform_0(%arg0: i32, %arg1: i32) -> (i32, i32, i32) {
    %c0_i32 = arith.constant 0 : i32
    %c0_i32_0 = arith.constant 0 : i32
    return %arg0, %c0_i32, %arg1 : i32, i32, i32
  }
  func.func @transform_1(%arg0: i32, %arg1: i32) -> (i32, i32) {
    %c0_i32 = arith.constant 0 : i32
    %c0_i32_0 = arith.constant 0 : i32
    %c0_i32_1 = arith.constant 0 : i32
    return %c0_i32, %c0_i32_0 : i32, i32
  }
  func.func @transform_2(%arg0: i32, %arg1: i32) -> (i32, i32) {
    %c0_i32 = arith.constant 0 : i32
    %c0_i32_0 = arith.constant 0 : i32
    %c0_i32_1 = arith.constant 0 : i32
    return %c0_i32, %c0_i32_0 : i32, i32
  }
  func.func @transform_3(%arg0: i32, %arg1: i32) -> (i32, i32, i32) {
    %c0_i32 = arith.constant 0 : i32
    %c0_i32_0 = arith.constant 0 : i32
    %c0_i32_1 = arith.constant 0 : i32
    return %arg0, %c0_i32, %c0_i32_0 : i32, i32, i32
  }
}

</mosaic_0001>

<bundles_post_ra>
// kernel: tpu_custom_call.1
= control target key start
LH: loop header
LB: loop body
LE: loop exit
PB: predicated region body
PF: predicated region fallthrough
CT: control target
= control target key end

     0   :  { %8 = vsyncpa [#allocation4], 0  ;;  %s313_s0 = inlined_call_operand.hbm [shape: f32[2,4,256], index: 0, kind: input, shape index: {}]   ;;  %s314_s1 = inlined_call_operand.hbm [shape: f32[4,4], index: 1, kind: input, shape index: {}]   ;;  %s315_s2 = inlined_call_operand.vmem [shape: f32[1,4], index: 2, kind: input, shape index: {}]   ;;  %s316_s3 = inlined_call_operand.hbm [shape: f32[2,1,4], index: 3, kind: output, shape index: {}]  }
   0x1   :  { %9 = vsyncpa [#allocation7], 0 }
   0x2   :  { %10 = vsyncpa [#allocation5], 0  ;;  %s15_s14 = sshll.u32 %s313_s0, 4  ;;  %s268_s15 = smov [#allocation3]   ;;  %s16_s14 = int_to_ptr.hbm [resolvable:$true] %s15_s14 }
   0x3   :  { %s17_s16 = sshll.u32 %s268_s15, 4  ;;  %s29_s19 = sshll.u32 %s314_s1, 4  ;;  %s18_s16 = int_to_ptr.vmem [resolvable:$true] %s17_s16  ;;  %s30_s19 = int_to_ptr.hbm [resolvable:$true] %s29_s19 }
   0x4   :  { %s269_s20 = smov 128   ;;  %s270_s21 = smov 8  }
   0x5   :  { %23 = dma.hbm_to_vmem [thread:$0]  %s16_s14, 256, %s18_s16, [#allocation4], %s269_s20, %s269_s20, %s270_s21  }
   0x6   :  { %s271_s22 = smov [#allocation6]  }
   0x7   :  { %s31_s23 = sshll.u32 %s271_s22, 4  ;;  %s32_s23 = int_to_ptr.vmem [resolvable:$true] %s31_s23 }
   0x8   :  { %34 = dma.hbm_to_vmem [thread:$0]  %s30_s19, 64, %s32_s23, [#allocation7]  }
   0x9   :  { %262 = dma.done.wait [#allocation4], 256  }
   0xa   :  { %263 = vsyncadd [#allocation4], 4294967040 }
   0xb   :  { %264 = dma.done.wait [#allocation7], 64  }
   0xc   :  { %265 = vsyncadd [#allocation7], 4294967232  ;;  %v52_v0 = vld [vmem:[#allocation3] sm:$0xff]  ;;  %v53_v1 = vld [vmem:[#allocation3 + $0x8] sm:$0xff]  ;;  %vm69_vm0 = vcmask 1043456   ;;  %vm49_vm1 = vcmask 25600   ;;  %v82_v17 = vlaneseq }
   0xd   :  { %v54_v2 = vand.u32 2147483647, %v52_v0  ;;  %v55_v3 = vand.u32 2147483647, %v53_v1  ;;  %v272_v14 = vmov 0.0   ;;  %vm86_vm2 = vcmask 1041409  }
   0xe   :  { %50 = vst.msk [vmem:[#allocation2] sm:$0x3] %vm49_vm1, %v272_v14  ;;  %v97_v15 = vld [vmem:[#allocation6] sm:$0xf]  ;;  %v83_v18 = vand.u32 127, %v82_v17  ;;  %vm102_vm3 = vcmask 31744  }
   0xf   :  { %58 = vst [vmem:[#allocation1] ss:$2 sm:$0xff] %v54_v2  ;;  %174 = vmatpush.msk.msra.mxu0 %vm69_vm0, %v97_v15  ;;  %v185_v27 = vld [vmem:[%s315_s2] ss:$0 sm:$0xff]  ;;  %s273_s24 = smov [#allocation8]   ;;  %s160_s27 = sshll.u32 %s316_s3, 4  ;;  %s161_s27 = int_to_ptr.hbm [resolvable:$true] %s160_s27 }
  0x10   :  { %62 = vst [vmem:[#allocation1 + $0x10] ss:$2 sm:$0xff] %v55_v3  ;;  %s158_s25 = sshll.u32 %s273_s24, 4  ;;  %vm151_vm7 = vcmask 24576   ;;  %s274_s28 = smov 16   ;;  %s159_s25 = int_to_ptr.vmem [resolvable:$true] %s158_s25 }
  0x11   :  { %s275_s29 = smov 1  }
  0x15   :  { %v51_v21 = vld [vmem:[#allocation2] sm:$0x3] }
  0x16   :  { %v59_v4 = vld.sshfl [vmem:[#allocation1] sm:$0xff pattern:$0x75316420]  ;;  %v60_v5 = vld.sshfl [vmem:[#allocation1 + $0x8] sm:$0xff pattern:$0x75316420] }
  0x17   :  { %v70_v6 = vsel %vm69_vm0, %v59_v4, 0.0  ;;  %v71_v7 = vsel %vm69_vm0, %v60_v5, 0.0  ;;  %v63_v9 = vld.sshfl [vmem:[#allocation1 + $0x10] sm:$0xff pattern:$0x75316420] }
  0x18   :  { %v72_v8 = vadd.f32 %v71_v7, %v70_v6  ;;  %v64_v10 = vld.sshfl [vmem:[#allocation1 + $0x18] sm:$0xff pattern:$0x75316420]  ;;  %v75_v11 = vsel %vm69_vm0, %v63_v9, 0.0 }
  0x19   :  { %v76_v12 = vsel %vm69_vm0, %v64_v10, 0.0 }
  0x1a   :  { %73 = vadd.xlane.f32.xlu0 %v72_v8  ;;  %v77_v13 = vadd.f32 %v76_v12, %v75_v11 }
  0x22   :  { %78 = vadd.xlane.f32.xlu0 %v77_v13 }
  0x8d   :  { %v74_v16 = vpop.xlane.xlu0 %73 }
  0x8e   :  { %v84_v20 = vperm.slane %v74_v16, %v83_v18 }
  0x95   :  { %v79_v19 = vpop.xlane.xlu0 %78 }
  0x96   :  { %v85_v22 = vperm.slane %v79_v19, %v83_v18 }
  0x98   :  { %v87_v23 = vsel %vm86_vm2, %v85_v22, %v84_v20 }
  0x99   :  { %v89_v24 = vadd.f32 %v87_v23, %v51_v21 }
  0x9b   :  { %91 = vst.msk [vmem:[#allocation2] sm:$0x3] %vm49_vm1, %v89_v24 }
  0xa2   :  { %v95_v25 = vld [vmem:[#allocation2] sm:$0x3] }
  0xa3   :  { %v96_v26 = vmul.f32 0.00390625, %v95_v25 }
  0xa5   :  { %175 = vmatmul.msk.f32.vlgmr.msra.gmra.mxu0 %vm102_vm3, %v96_v26 }
 0x122   :  { %v126_v28 = vpop.f32.mrf.mxu0 }
 0x123   :  { %v127_v29 = vadd.f32 %v185_v27, %v126_v28 }
 0x125   :  { %v176_v30 = vmul.f32 -1.442695, %v127_v29 }
 0x127   :  { %186 = vpow2.f32 %v176_v30 }
 0x12d   :  { %v187_v31 = vpop.eup %186 }
 0x12e   :  { %v132_v32 = vadd.f32 1.0, %v187_v31 }
 0x130   :  { %188 = vrcp.f32 %v132_v32  ;;  %v144_v36 = vand.u32 2147483648, %v132_v32  ;;  %v142_v38 = vand.u32 2147483647, %v132_v32  ;;  %vm138_vm5 = vweird.f32 %v132_v32 }
 0x132   :  { %v145_v40 = vor.u32 1.1754944e-38, %v144_v36  ;;  %vm143_vm8 = vcmp.eq.f32.partialorder %v142_v38, 8.507059e+37 }
 0x136   :  { %v189_v33 = vpop.eup %188 }
 0x137   :  { %v134_v34 = vmul.f32 %v189_v33, %v132_v32  ;;  %vm139_vm4 = vweird.f32 %v189_v33 }
 0x138   :  { %vm140_vm6 = vmor %vm138_vm5, %vm139_vm4 }
 0x139   :  { %v135_v35 = vsub.f32 1.0, %v134_v34 }
 0x13b   :  { %v136_v37 = vmul.f32 %v189_v33, %v135_v35 }
 0x13d   :  { %v137_v39 = vadd.f32 %v189_v33, %v136_v37 }
 0x13f   :  { %v141_v41 = vsel %vm140_vm6, %v189_v33, %v137_v39 }
 0x140   :  { %v146_v42 = vsel %vm143_vm8, %v145_v40, %v141_v41 }
 0x141   :  { %v149_v43 = vrot.slane %v146_v42, 1  ;;  %152 = vst.msk [vmem:[#allocation8] sm:$0x1] %vm151_vm7, %v146_v42 }
 0x143   :  { %153 = vst.msk [vmem:[#allocation8 + $0x1] sm:$0x1] %vm151_vm7, %v149_v43 }
 0x144   :  { %166 = dma.vmem_to_hbm [thread:$0]  %s159_s25, 32, %s161_s27, [#allocation5], %s274_s28, %s274_s28, %s275_s29  }
 0x145   :  { %266 = dma.done.wait [#allocation5], 32  }
 0x146   :  { %267 = vsyncadd [#allocation5], 4294967264 }
 0x147   :  { %171 = vsyncpa [#allocation4], 1 }
 0x148   :  { %172 = vsyncpa [#allocation7], 1 }
 0x149   :  { %173 = vsyncpa [#allocation5], 1 }

</bundles_post_ra>
